<compile_context>
chip_gen: v7x
topology: tpu7x:2x2x1
jax: 0.10.0
libtpu: 0.0.40
codegen_flags: <defaults>
</compile_context>

<pallas_src>
import jax
import jax.numpy as jnp
from jax.experimental import pallas as pl
from jax.experimental.pallas import tpu as pltpu


# ----------------------------- helpers -------------------------------------

def _round_up(n, m):
    return ((n + m - 1) // m) * m


def _pad_to(a, shape):
    pads = [(0, t - s) for s, t in zip(a.shape, shape)]
    return jnp.pad(a, pads)


# ----------------------------- kernel --------------------------------------

def autoencoder_kernel(x_ref,
                       w1_ref, b1_ref,
                       w2_ref, b2_ref,
                       w3_ref, b3_ref,
                       w4_ref, b4_ref,
                       out_ref):
    # x tile: (TM, D) in the caller's dtype (bf16 in the demo). Weights bf16,
    # biases f32 (1, N) rows. All matmuls accumulate f32 on the MXU.
    x = x_ref[...].astype(jnp.bfloat16)

    # ---- encoder ----
    h1 = jnp.dot(x, w1_ref[...],
                 preferred_element_type=jnp.float32) + b1_ref[...]
    h1 = jnp.maximum(h1, 0.0)                                   # ReLU (f32, VPU)
    z = jnp.dot(h1.astype(jnp.bfloat16), w2_ref[...],
                preferred_element_type=jnp.float32) + b2_ref[...]

    # ---- decoder ----
    h2 = jnp.dot(z.astype(jnp.bfloat16), w3_ref[...],
                 preferred_element_type=jnp.float32) + b3_ref[...]
    h2 = jnp.maximum(h2, 0.0)                                   # ReLU (f32, VPU)
    y = jnp.dot(h2.astype(jnp.bfloat16), w4_ref[...],
                preferred_element_type=jnp.float32) + b4_ref[...]

    # sigmoid(y) = 0.5 * tanh(0.5 * y) + 0.5  -> single EUP push.
    out_ref[...] = (0.5 * jnp.tanh(0.5 * y) + 0.5).astype(out_ref.dtype)


# ----------------------------- wrapper -------------------------------------

def autoencoder_forward(x, padded_params, *, block_m=1024, out_dtype=None):
    """x: (B, input_dim). padded_params: output of prepare_params().

    Streams x/out along the batch; weights & biases stay VMEM-resident.
    Output dtype defaults to x.dtype (bf16 in -> bf16 out, halving HBM bytes).
    """
    B, D = x.shape
    p = padded_params
    assert p["w1"].shape[0] == D, "input_dim mismatch with prepared params"
    Hp = p["w1"].shape[1]          # lane-padded hidden_dim
    Lp = p["w2"].shape[1]          # lane-padded latent_dim
    out_dtype = out_dtype or x.dtype

    # Batch tile: as large as block_m (amortizes ~0.35 us/grid-step overhead),
    # multiple of 16 (bf16 sublane packing), but capped so the grid keeps
    # >= 2 steps whenever the batch allows it (v7x: 2 TCs shard "parallel").
    TM = max(16, min(block_m, _round_up(pl.cdiv(B, 2), 16)))
    grid = (pl.cdiv(B, TM),)       # ragged last block handled by Pallas

    # x / out are tiled along the batch; weights & biases keep block index
    # (0, 0) for every grid step, so Pallas leaves them resident in VMEM.
    x_spec = pl.BlockSpec((TM, D), lambda i: (i, 0))
    out_spec = pl.BlockSpec((TM, D), lambda i: (i, 0))

    def resident(shape):
        return pl.BlockSpec(shape, lambda i: (0, 0))

    in_specs = [
        x_spec,
        resident((D, Hp)), resident((1, Hp)),    # w1, b1
        resident((Hp, Lp)), resident((1, Lp)),   # w2, b2
        resident((Lp, Hp)), resident((1, Hp)),   # w3, b3
        resident((Hp, D)), resident((1, D)),     # w4, b4
    ]

    out = pl.pallas_call(
        autoencoder_kernel,
        out_shape=jax.ShapeDtypeStruct((B, D), out_dtype),
        grid=grid,
        in_specs=in_specs,
        out_specs=out_spec,
        compiler_params=pltpu.CompilerParams(
            dimension_semantics=("parallel",)),
    )(x,
      p["w1"], p["b1"], p["w2"], p["b2"],
      p["w3"], p["b3"], p["w4"], p["b4"])

    return out


# ----------------------------- params --------------------------------------

def init_params(key, input_dim, hidden_dim):
    """PyTorch-style init; weights stored as (in_features, out_features) f32."""
    latent_dim = hidden_dim // 2
    ks = jax.random.split(key, 8)

    def lin(kw, kb, fan_in, fan_out):
        bound = 1.0 / jnp.sqrt(float(fan_in))
        w = jax.random.uniform(kw, (fan_in, fan_out), jnp.float32, -bound, bound)
        b = jax.random.uniform(kb, (1, fan_out), jnp.float32, -bound, bound)
        return w, b

    w1, b1 = lin(ks[0], ks[1], input_dim, hidden_dim)
    w2, b2 = lin(ks[2], ks[3], hidden_dim, latent_dim)
    w3, b3 = lin(ks[4], ks[5], latent_dim, hidden_dim)
    w4, b4 = lin(ks[6], ks[7], hidden_dim, input_dim)
    return {"w1": w1, "b1": b1, "w2": w2, "b2": b2,
            "w3": w3, "b3": b3, "w4": w4, "b4": b4}


def prepare_params(params):
    """Zero-pad hidden/latent dims to multiples of 128 lanes (these live only
    in VMEM, so padding is free in HBM bytes) and cast weights to bf16 for the
    MXU. The input/output dim D is left unpadded so streamed x/out traffic is
    not inflated. Zero padding is exact: padded hidden/latent columns stay 0
    through bias/ReLU and contribute 0 to the next matmul."""
    D = params["w1"].shape[0]
    H = params["w1"].shape[1]
    L = params["w2"].shape[1]
    Hp = _round_up(H, 128)
    Lp = _round_up(L, 128)

    def w(a, shape):
        return _pad_to(a, shape).astype(jnp.bfloat16)

    def b(a, shape):
        return _pad_to(a, shape).astype(jnp.float32)

    return {
        "w1": w(params["w1"], (D, Hp)), "b1": b(params["b1"], (1, Hp)),
        "w2": w(params["w2"], (Hp, Lp)), "b2": b(params["b2"], (1, Lp)),
        "w3": w(params["w3"], (Lp, Hp)), "b3": b(params["b3"], (1, Hp)),
        "w4": w(params["w4"], (Hp, D)), "b4": b(params["b4"], (1, D)),
    }


def reference_forward(x, p):
    """Plain-JAX f32 reference for sanity checking."""
    h1 = jnp.maximum(x @ p["w1"] + p["b1"], 0.0)
    z = h1 @ p["w2"] + p["b2"]
    h2 = jnp.maximum(z @ p["w3"] + p["b3"], 0.0)
    y = h2 @ p["w4"] + p["b4"]
    return jax.nn.sigmoid(y)


if __name__ == "__main__":
    key = jax.random.PRNGKey(0)
    k_x, k_p = jax.random.split(key)

    batch = 200          # not a multiple of the tile -> exercises ragged last block
    input_dim = 64
    hidden_dim = 32

    x_f32 = jax.random.uniform(k_x, (batch, input_dim), jnp.float32)
    x = x_f32.astype(jnp.bfloat16)        # bf16 streaming of the only HBM inputs

    params = init_params(k_p, input_dim, hidden_dim)
    padded_params = prepare_params(params)

    out = autoencoder_forward(x, padded_params)
    out = jax.block_until_ready(out)

    ref = reference_forward(x.astype(jnp.float32), params)
    assert out.shape == (batch, input_dim)
    # bf16 weights/activations/output + f32 MXU accumulation -> loose tolerance.
    max_err = float(jnp.max(jnp.abs(out.astype(jnp.float32) - ref)))
    assert max_err < 2e-2, f"mismatch vs reference, max_err={max_err}"

    print("KERNEL_OK")
</pallas_src>

<mosaic_0001>
module attributes {stable_mosaic.version = 11 : i64} {
  func.func @autoencoder_kernel(%arg0: i32, %arg1: memref<112x64xbf16, #tpu.memory_space<vmem>>, %arg2: memref<64x128xbf16, #tpu.memory_space<vmem>>, %arg3: memref<1x128xf32, #tpu.memory_space<vmem>>, %arg4: memref<128x128xbf16, #tpu.memory_space<vmem>>, %arg5: memref<1x128xf32, #tpu.memory_space<vmem>>, %arg6: memref<128x128xbf16, #tpu.memory_space<vmem>>, %arg7: memref<1x128xf32, #tpu.memory_space<vmem>>, %arg8: memref<128x64xbf16, #tpu.memory_space<vmem>>, %arg9: memref<1x64xf32, #tpu.memory_space<vmem>>, %arg10: memref<112x64xbf16, #tpu.memory_space<vmem>>) attributes {dimension_semantics = [#tpu.dimension_semantics<parallel>], iteration_bounds = array<i64: 2>, scalar_prefetch = 0 : i64, scratch_operands = 0 : i64, tpu.core_type = #tpu.core_type<tc>, window_params = [{transform_indices = @transform_0, window_bounds = array<i64: 112, 64>}, {pipeline_mode = #tpu.pipeline_mode<synchronous>, transform_indices = @transform_1, window_bounds = array<i64: 64, 128>}, {pipeline_mode = #tpu.pipeline_mode<synchronous>, transform_indices = @transform_2, window_bounds = array<i64: 1, 128>}, {pipeline_mode = #tpu.pipeline_mode<synchronous>, transform_indices = @transform_3, window_bounds = array<i64: 128, 128>}, {pipeline_mode = #tpu.pipeline_mode<synchronous>, transform_indices = @transform_4, window_bounds = array<i64: 1, 128>}, {pipeline_mode = #tpu.pipeline_mode<synchronous>, transform_indices = @transform_5, window_bounds = array<i64: 128, 128>}, {pipeline_mode = #tpu.pipeline_mode<synchronous>, transform_indices = @transform_6, window_bounds = array<i64: 1, 128>}, {pipeline_mode = #tpu.pipeline_mode<synchronous>, transform_indices = @transform_7, window_bounds = array<i64: 128, 64>}, {pipeline_mode = #tpu.pipeline_mode<synchronous>, transform_indices = @transform_8, window_bounds = array<i64: 1, 64>}, {transform_indices = @transform_9, window_bounds = array<i64: 112, 64>}]} {
    %c0 = arith.constant 0 : index
    %c0_0 = arith.constant 0 : index
    %0 = vector.load %arg1[%c0, %c0_0] : memref<112x64xbf16, #tpu.memory_space<vmem>>, vector<112x64xbf16>
    %c0_1 = arith.constant 0 : index
    %c0_2 = arith.constant 0 : index
    %1 = vector.load %arg2[%c0_1, %c0_2] : memref<64x128xbf16, #tpu.memory_space<vmem>>, vector<64x128xbf16>
    %cst = arith.constant dense<0.000000e+00> : vector<112x128xf32>
    %2 = tpu.matmul %0, %1, %cst {dimension_numbers = #tpu.dot_dimension_numbers<[1], [0], [0], [1], [0, 0, 1, 1], [], []>} : vector<112x64xbf16>, vector<64x128xbf16>, vector<112x128xf32> -> vector<112x128xf32>
    %c0_3 = arith.constant 0 : index
    %c0_4 = arith.constant 0 : index
    %3 = vector.load %arg3[%c0_3, %c0_4] : memref<1x128xf32, #tpu.memory_space<vmem>>, vector<1x128xf32>
    %4 = vector.broadcast %3 : vector<1x128xf32> to vector<112x128xf32>
    %5 = arith.addf %2, %4 : vector<112x128xf32>
    %cst_5 = arith.constant 0.000000e+00 : f32
    %6 = vector.broadcast %cst_5 : f32 to vector<112x128xf32>
    %7 = arith.maximumf %5, %6 : vector<112x128xf32>
    %8 = arith.truncf %7 : vector<112x128xf32> to vector<112x128xbf16>
    %c0_6 = arith.constant 0 : index
    %c0_7 = arith.constant 0 : index
    %9 = vector.load %arg4[%c0_6, %c0_7] : memref<128x128xbf16, #tpu.memory_space<vmem>>, vector<128x128xbf16>
    %cst_8 = arith.constant dense<0.000000e+00> : vector<112x128xf32>
    %10 = tpu.matmul %8, %9, %cst_8 {dimension_numbers = #tpu.dot_dimension_numbers<[1], [0], [0], [1], [0, 0, 1, 1], [], []>} : vector<112x128xbf16>, vector<128x128xbf16>, vector<112x128xf32> -> vector<112x128xf32>
    %c0_9 = arith.constant 0 : index
    %c0_10 = arith.constant 0 : index
    %11 = vector.load %arg5[%c0_9, %c0_10] : memref<1x128xf32, #tpu.memory_space<vmem>>, vector<1x128xf32>
    %12 = vector.broadcast %11 : vector<1x128xf32> to vector<112x128xf32>
    %13 = arith.addf %10, %12 : vector<112x128xf32>
    %14 = arith.truncf %13 : vector<112x128xf32> to vector<112x128xbf16>
    %c0_11 = arith.constant 0 : index
    %c0_12 = arith.constant 0 : index
    %15 = vector.load %arg6[%c0_11, %c0_12] : memref<128x128xbf16, #tpu.memory_space<vmem>>, vector<128x128xbf16>
    %cst_13 = arith.constant dense<0.000000e+00> : vector<112x128xf32>
    %16 = tpu.matmul %14, %15, %cst_13 {dimension_numbers = #tpu.dot_dimension_numbers<[1], [0], [0], [1], [0, 0, 1, 1], [], []>} : vector<112x128xbf16>, vector<128x128xbf16>, vector<112x128xf32> -> vector<112x128xf32>
    %c0_14 = arith.constant 0 : index
    %c0_15 = arith.constant 0 : index
    %17 = vector.load %arg7[%c0_14, %c0_15] : memref<1x128xf32, #tpu.memory_space<vmem>>, vector<1x128xf32>
    %18 = vector.broadcast %17 : vector<1x128xf32> to vector<112x128xf32>
    %19 = arith.addf %16, %18 : vector<112x128xf32>
    %cst_16 = arith.constant 0.000000e+00 : f32
    %20 = vector.broadcast %cst_16 : f32 to vector<112x128xf32>
    %21 = arith.maximumf %19, %20 : vector<112x128xf32>
    %22 = arith.truncf %21 : vector<112x128xf32> to vector<112x128xbf16>
    %c0_17 = arith.constant 0 : index
    %c0_18 = arith.constant 0 : index
    %23 = vector.load %arg8[%c0_17, %c0_18] : memref<128x64xbf16, #tpu.memory_space<vmem>>, vector<128x64xbf16>
    %cst_19 = arith.constant dense<0.000000e+00> : vector<112x64xf32>
    %24 = tpu.matmul %22, %23, %cst_19 {dimension_numbers = #tpu.dot_dimension_numbers<[1], [0], [0], [1], [0, 0, 1, 1], [], []>} : vector<112x128xbf16>, vector<128x64xbf16>, vector<112x64xf32> -> vector<112x64xf32>
    %c0_20 = arith.constant 0 : index
    %c0_21 = arith.constant 0 : index
    %25 = vector.load %arg9[%c0_20, %c0_21] : memref<1x64xf32, #tpu.memory_space<vmem>>, vector<1x64xf32>
    %26 = vector.broadcast %25 : vector<1x64xf32> to vector<112x64xf32>
    %27 = arith.addf %24, %26 : vector<112x64xf32>
    %cst_22 = arith.constant 5.000000e-01 : f32
    %28 = vector.broadcast %cst_22 : f32 to vector<112x64xf32>
    %29 = arith.mulf %28, %27 : vector<112x64xf32>
    %30 = math.tanh %29 : vector<112x64xf32>
    %cst_23 = arith.constant 5.000000e-01 : f32
    %31 = vector.broadcast %cst_23 : f32 to vector<112x64xf32>
    %32 = arith.mulf %31, %30 : vector<112x64xf32>
    %cst_24 = arith.constant 5.000000e-01 : f32
    %33 = vector.broadcast %cst_24 : f32 to vector<112x64xf32>
    %34 = arith.addf %32, %33 : vector<112x64xf32>
    %35 = arith.truncf %34 : vector<112x64xf32> to vector<112x64xbf16>
    %c0_25 = arith.constant 0 : index
    %c0_26 = arith.constant 0 : index
    %36 = vector.load %arg10[%c0_25, %c0_26] : memref<112x64xbf16, #tpu.memory_space<vmem>>, vector<112x64xbf16>
    tpu.vector_store %arg10[%c0_25, %c0_26], %35 {strides = array<i32>} : memref<112x64xbf16, #tpu.memory_space<vmem>>, vector<112x64xbf16>,
    return
  }
  func.func @transform_0(%arg0: i32) -> (i32, i32) {
    %c0_i32 = arith.constant 0 : i32
    %c0_i32_0 = arith.constant 0 : i32
    return %arg0, %c0_i32 : i32, i32
  }
  func.func @transform_1(%arg0: i32) -> (i32, i32) {
    %c0_i32 = arith.constant 0 : i32
    %c0_i32_0 = arith.constant 0 : i32
    %c0_i32_1 = arith.constant 0 : i32
    return %c0_i32, %c0_i32_0 : i32, i32
  }
  func.func @transform_2(%arg0: i32) -> (i32, i32) {
    %c0_i32 = arith.constant 0 : i32
    %c0_i32_0 = arith.constant 0 : i32
    %c0_i32_1 = arith.constant 0 : i32
    return %c0_i32, %c0_i32_0 : i32, i32
  }
  func.func @transform_3(%arg0: i32) -> (i32, i32) {
    %c0_i32 = arith.constant 0 : i32
    %c0_i32_0 = arith.constant 0 : i32
    %c0_i32_1 = arith.constant 0 : i32
    return %c0_i32, %c0_i32_0 : i32, i32
  }
  func.func @transform_4(%arg0: i32) -> (i32, i32) {
    %c0_i32 = arith.constant 0 : i32
    %c0_i32_0 = arith.constant 0 : i32
    %c0_i32_1 = arith.constant 0 : i32
    return %c0_i32, %c0_i32_0 : i32, i32
  }
  func.func @transform_5(%arg0: i32) -> (i32, i32) {
    %c0_i32 = arith.constant 0 : i32
    %c0_i32_0 = arith.constant 0 : i32
    %c0_i32_1 = arith.constant 0 : i32
    return %c0_i32, %c0_i32_0 : i32, i32
  }
  func.func @transform_6(%arg0: i32) -> (i32, i32) {
    %c0_i32 = arith.constant 0 : i32
    %c0_i32_0 = arith.constant 0 : i32
    %c0_i32_1 = arith.constant 0 : i32
    return %c0_i32, %c0_i32_0 : i32, i32
  }
  func.func @transform_7(%arg0: i32) -> (i32, i32) {
    %c0_i32 = arith.constant 0 : i32
    %c0_i32_0 = arith.constant 0 : i32
    %c0_i32_1 = arith.constant 0 : i32
    return %c0_i32, %c0_i32_0 : i32, i32
  }
  func.func @transform_8(%arg0: i32) -> (i32, i32) {
    %c0_i32 = arith.constant 0 : i32
    %c0_i32_0 = arith.constant 0 : i32
    %c0_i32_1 = arith.constant 0 : i32
    return %c0_i32, %c0_i32_0 : i32, i32
  }
  func.func @transform_9(%arg0: i32) -> (i32, i32) {
    %c0_i32 = arith.constant 0 : i32
    %c0_i32_0 = arith.constant 0 : i32
    return %arg0, %c0_i32 : i32, i32
  }
}

</mosaic_0001>

<bundles_post_ra>
// kernel: tpu_custom_call.1
= control target key start
LH: loop header
LB: loop body
LE: loop exit
PB: predicated region body
PF: predicated region fallthrough
CT: control target
= control target key end

     0   :  { %s2109_s30 = smov 0   ;;  %s2111_s10 = smov 0   ;;  %s2523_s0 = inlined_call_operand.vmem [shape: bf16[200,64], index: 0, kind: input, shape index: {}]   ;;  %s2524_s1 = inlined_call_operand.vmem [shape: bf16[64,128], index: 1, kind: input, shape index: {}]   ;;  %s2525_s2 = inlined_call_operand.vmem [shape: f32[1,128], index: 2, kind: input, shape index: {}]   ;;  %s2526_s3 = inlined_call_operand.vmem [shape: bf16[128,128], index: 3, kind: input, shape index: {}]   ;;  %s2527_s4 = inlined_call_operand.vmem [shape: f32[1,128], index: 4, kind: input, shape index: {}]   ;;  %s2528_s5 = inlined_call_operand.vmem [shape: bf16[128,128], index: 5, kind: input, shape index: {}]   ;;  %s2529_s6 = inlined_call_operand.vmem [shape: f32[1,128], index: 6, kind: input, shape index: {}]   ;;  %s2530_s7 = inlined_call_operand.vmem [shape: bf16[128,64], index: 7, kind: input, shape index: {}]   ;;  %s2531_s8 = inlined_call_operand.vmem [shape: f32[1,64], index: 8, kind: input, shape index: {}]   ;;  %s2532_s9 = inlined_call_operand.vmem [shape: bf16[200,64], index: 9, kind: output, shape index: {}]  }
   0x1   :  { %s2113_s11 = smov 0  }
   0x2 LB: > { %s2122_s12 = sadd.s32 4294967295, %s2023_s11   ;;  %s2124_s13 = sadd.s32 1, %s2023_s11   ;;  %s2023_s11 = sphi %s2113_s11, %s2539_s11   ;;  %s2019_s10 = sphi %s2111_s10, %s2538_s10   ;;  %s2015_s30 = sphi %s2109_s30, %s2537_s30  }
   0x3   : > { %s217_s14 = ssub.s32 %s2023_s11, %s2124_s13  ;;  %s220_s15 = sadd.s32 1, %s2019_s10 }
   0x4   : > { %p218_p0 = scmp.eq.s32.totalorder %s217_s14, 0  ;;  %p230_p1 = scmp.ne.s32.totalorder %s2019_s10, %s2015_s30 }
   0x5   : > { %p231_p2 = scmp.eq.s32.totalorder %s2122_s12, 1  ;;  %p1481_p3 = scmp.ge.s32.totalorder %s2023_s11, 1 }
   0x6   : > { %s2132_s16 = scalar_select %p218_p0, %s2019_s10, %s220_s15  }
   0x7   : > { %p2134_p4 = por %p231_p2, %p230_p1  ;;  %p296_p5 = scmp.lt.s32.totalorder %s2023_s11, 3 }
   0x9   : > { %p297_p6 = pnand %p1481_p3, %p296_p5 }
   0xa   : > { %v1902_v0 = vld [vmem:[%s2524_s1] sm:$0xff] (!%p297_p6)   ;;  %v2057_v1 = vmov (!%p297_p6), 0.0   ;;  %v1903_v2 = vld [vmem:[%s2524_s1 + $0x8] sm:$0xff] (!%p297_p6)   ;;  %vm2058_vm0 = vmmov (!%p297_p6), 0   ;;  %s2149_s22 = smul.u32 (!%p297_p6), 14, %s2122_s12  ;;  %v1904_v4 = vld [vmem:[%s2524_s1 + $0x10] sm:$0xff] (!%p297_p6)  }
   0xb   : > { %300 = sbr.rel (%p297_p6) target bundleno = 1040 (0x410), region = 56  ;;  %1626 = vmatprep.subr.bf16.mxu0 (!%p297_p6), %v2057_v1  ;;  %1662 = vmatprep.subr.bf16.mxu1 (!%p297_p6), %v2057_v1  ;;  %v1913_v3 = vld [vmem:[%s2526_s3] sm:$0xff] (!%p297_p6)   ;;  %v1914_v5 = vld [vmem:[%s2526_s3 + $0x8] sm:$0xff] (!%p297_p6)   ;;  %v1905_v6 = vld [vmem:[%s2524_s1 + $0x18] sm:$0xff] (!%p297_p6)   ;;  %vm443_vm1 = vcmask (!%p297_p6), 523264   ;;  %s332_s15 = sand.u32 (!%p297_p6), 1, %s2015_s30  }
   0xc   : > { %1627 = vmatpush3.bf16.msra.mxu0 (!%p297_p6), %v1902_v0  ;;  %1634 = vmatprep.mubr.msk.bf16.mxu0 (!%p297_p6), %vm2058_vm0, %v2057_v1  ;;  %p340_p7 = scmp.lt.s32.totalorder (!%p297_p6), %s2149_s22, 24  ;;  %v1915_v7 = vld [vmem:[%s2526_s3 + $0x10] sm:$0xff] (!%p297_p6)   ;;  %v1916_v9 = vld [vmem:[%s2526_s3 + $0x18] sm:$0xff] (!%p297_p6)   ;;  %v1917_v10 = vld [vmem:[%s2526_s3 + $0x20] sm:$0xff] (!%p297_p6)   ;;  %s1810_s18 = smul.u32 (!%p297_p6), 56, %s332_s15  ;;  %vm1195_vm2 = vcmask (!%p297_p6), 519168  }
   0xd   : > { %1628 = vmatprep.subr.bf16.mxu0 (!%p297_p6), %v2057_v1  ;;  %1678 = vmatprep.mubr.msk.bf16.mxu1 (!%p297_p6), %vm2058_vm0, %v2057_v1  ;;  %v1918_v12 = vld [vmem:[%s2526_s3 + $0x28] sm:$0xff] (!%p297_p6)   ;;  %v1919_v18 = vld [vmem:[%s2526_s3 + $0x30] sm:$0xff] (!%p297_p6)   ;;  %v1920_v19 = vld [vmem:[%s2526_s3 + $0x38] sm:$0xff] (!%p297_p6)  }
   0xe   : > { %1663 = vmatpush3.bf16.msra.mxu1 (!%p297_p6), %v1913_v3  ;;  %v1921_v20 = vld [vmem:[%s2528_s5] sm:$0xff] (!%p297_p6)   ;;  %v1922_v21 = vld [vmem:[%s2528_s5 + $0x8] sm:$0xff] (!%p297_p6)   ;;  %v1923_v22 = vld [vmem:[%s2528_s5 + $0x10] sm:$0xff] (!%p297_p6)   ;;  %s2407_s30 = scalar_lea.vmem (!%p297_p6), [#allocation2], %s1810_s18  }
   0xf   : > { %1664 = vmatprep.subr.bf16.mxu1 (!%p297_p6), %v2057_v1  ;;  %v1924_v23 = vld [vmem:[%s2528_s5 + $0x18] sm:$0xff] (!%p297_p6)   ;;  %v1925_v24 = vld [vmem:[%s2528_s5 + $0x20] sm:$0xff] (!%p297_p6)   ;;  %v1926_v25 = vld [vmem:[%s2528_s5 + $0x28] sm:$0xff] (!%p297_p6)  }
  0x10   : > { %1629 = vmatpush3.bf16.msra.mxu0 (!%p297_p6), %v1903_v2  ;;  %v1927_v26 = vld [vmem:[%s2528_s5 + $0x30] sm:$0xff] (!%p297_p6)   ;;  %v2261_v27 = vld [vmem:[%s2525_s2] ss:$0 sm:$0xff] (!%p297_p6) }
  0x11   : > { %1630 = vmatprep.subr.bf16.mxu0 (!%p297_p6), %v2057_v1 }
  0x12   : > { %s341_s27 = scalar_select %p340_p7, %s2149_s22, 24  ;;  %1665 = vmatpush3.bf16.msra.mxu1 %v1914_v5 }
  0x13   : > { %1666 = vmatprep.subr.bf16.mxu1 %v2057_v1  ;;  %s1218_s19 = ssub.s32 (%p2134_p4), 25, %s2149_s22 }
  0x14   : > { %s1482_s11 = sshll.u32 %s341_s27, 2  ;;  %1631 = vmatpush3.bf16.msra.mxu0 %v1904_v4  ;;  %p1219_p8 = scmp.lt.s32.totalorder (%p2134_p4), %s1218_s19, 14 }
  0x15   : > { %s2173_s20 = scalar_lea.vmem %s2523_s0, %s1482_s11  ;;  %1632 = vmatprep.subr.bf16.mxu0 %v2057_v1 }
  0x16   : > { %v1906_v8 = vld [vmem:[%s2173_s20] sm:$0xff]   ;;  %1667 = vmatpush3.bf16.msra.mxu1 %v1915_v7  ;;  %v1907_v11 = vld [vmem:[%s2173_s20 + $0x8] sm:$0xff]   ;;  %v1908_v13 = vld [vmem:[%s2173_s20 + $0x10] sm:$0xff]  }
  0x17   : > { %1668 = vmatprep.subr.bf16.mxu1 %v2057_v1  ;;  %v1909_v14 = vld [vmem:[%s2173_s20 + $0x18] sm:$0xff]   ;;  %v1910_v15 = vld [vmem:[%s2173_s20 + $0x20] sm:$0xff]   ;;  %v1911_v16 = vld [vmem:[%s2173_s20 + $0x28] sm:$0xff]  }
  0x18   : > { %1633 = vmatpush3.bf16.msra.mxu0 %v1905_v6  ;;  %v1912_v17 = vld [vmem:[%s2173_s20 + $0x30] sm:$0xff]   ;;  %s1569_s20 = smul.u32 (%p2134_p4), 56, %s2122_s12 }
  0x19   : > { %1706 = vmatprep.subr.bf16.mxu0 %v2057_v1 }
  0x1a   : > { %1669 = vmatpush3.bf16.msra.mxu1 %v1916_v9  ;;  %s2452_s24 = scalar_lea.vmem (%p2134_p4), %s2532_s9, %s1569_s20  }
  0x1b   : > { %1635 = vmatmul.mubr.msk.bf16.vlgmr.msra.gmra.mrb[0].mxu0 %vm443_vm1, %v1906_v8  ;;  %1670 = vmatprep.subr.bf16.mxu1 %v2057_v1 }
  0x1c   : > { %1638 = vmatprep.mubr.msk.bf16.mxu0 %vm2058_vm0, %v2057_v1  ;;  %1707 = vmatpush3.bf16.msra.mxu0 %v1921_v20 }
  0x1d   : > { %1708 = vmatprep.subr.bf16.mxu0 %v2057_v1 }
  0x1e   : > { %1671 = vmatpush3.bf16.msra.mxu1 %v1917_v10 }
  0x1f   : > { %1672 = vmatprep.subr.bf16.mxu1 %v2057_v1 }
  0x20   : > { %1709 = vmatpush3.bf16.msra.mxu0 %v1922_v21 }
  0x21   : > { %1710 = vmatprep.subr.bf16.mxu0 %v2057_v1 }
  0x22   : > { %1673 = vmatpush3.bf16.msra.mxu1 %v1918_v12 }
  0x23   : > { %1639 = vmatmul.mubr.msk.bf16.gmra.mrb[4].mxu0 %vm443_vm1, %v1907_v11  ;;  %1674 = vmatprep.subr.bf16.mxu1 %v2057_v1 }
  0x24   : > { %1642 = vmatprep.mubr.msk.bf16.mxu0 %vm2058_vm0, %v2057_v1  ;;  %1711 = vmatpush3.bf16.msra.mxu0 %v1923_v22 }
  0x25   : > { %1712 = vmatprep.subr.bf16.mxu0 %v2057_v1 }
  0x26   : > { %1675 = vmatpush3.bf16.msra.mxu1 %v1919_v18 }
  0x27   : > { %1676 = vmatprep.subr.bf16.mxu1 %v2057_v1 }
  0x28   : > { %1713 = vmatpush3.bf16.msra.mxu0 %v1924_v23 }
  0x29   : > { %1714 = vmatprep.subr.bf16.mxu0 %v2057_v1 }
  0x2a   : > { %1677 = vmatpush3.bf16.msra.mxu1 %v1920_v19 }
  0x2b   : > { %1643 = vmatmul.mubr.msk.bf16.gmra.mrb[8].mxu0 %vm443_vm1, %v1908_v13  ;;  %1794 = vmatprep.subr.bf16.mxu1 %v2057_v1 }
  0x2c   : > { %1646 = vmatprep.mubr.msk.bf16.mxu0 %vm2058_vm0, %v2057_v1  ;;  %1715 = vmatpush3.bf16.msra.mxu0 %v1925_v24 }
  0x2d   : > { %1716 = vmatprep.subr.bf16.mxu0 %v2057_v1 }
  0x30   : > { %1717 = vmatpush3.bf16.msra.mxu0 %v1926_v25 }
  0x31   : > { %1718 = vmatprep.subr.bf16.mxu0 %v2057_v1 }
  0x33   : > { %1647 = vmatmul.mubr.msk.bf16.gmra.mrb[12].mxu0 %vm443_vm1, %v1909_v14 }
  0x34   : > { %1650 = vmatprep.mubr.msk.bf16.mxu0 %vm2058_vm0, %v2057_v1  ;;  %1719 = vmatpush3.bf16.msra.mxu0 %v1927_v26 }
  0x35   : > { %1720 = vmatprep.subr.bf16.mxu0 %v2057_v1 }
  0x3b   : > { %1651 = vmatmul.mubr.msk.bf16.gmra.mrb[16].mxu0 %vm443_vm1, %v1910_v15 }
  0x3c   : > { %1654 = vmatprep.mubr.msk.bf16.mxu0 %vm2058_vm0, %v2057_v1 }
  0x43   : > { %1655 = vmatmul.mubr.msk.bf16.gmra.mrb[20].mxu0 %vm443_vm1, %v1911_v16 }
  0x44   : > { %1658 = vmatprep.mubr.msk.bf16.mxu0 %vm2058_vm0, %v2057_v1 }
  0x4b   : > { %1659 = vmatmul.mubr.msk.bf16.gmra.mrb[24].mxu0 %vm443_vm1, %v1912_v17 }
  0x4c   : > { %1722 = vmatprep.mubr.msk.bf16.mxu0 %vm2058_vm0, %v2057_v1 }
  0xee   : > { %v499_v28 = vpop.f32.mrb[0].mxu0 }
  0xef   : > { %v500_v29 = vadd.f32 %v2261_v27, %v499_v28  ;;  %v1636_v30 = vpop.f32.mrb[1].mxu0 }
  0xf0   : > { %v502_v31 = vpop.f32.mrb[2].mxu0  ;;  %v1929_v30 = vld [vmem:[%s2530_s7] sm:$0xff]  }
  0xf1   : > { %v503_v32 = vadd.f32 %v2261_v27, %v502_v31  ;;  %v1637_v33 = vpop.f32.mrb[3].mxu0  ;;  %v554_v34 = vmax.f32 %v500_v29, 0.0  ;;  %v1928_v29 = vld [vmem:[%s2528_s5 + $0x38] sm:$0xff]   ;;  %v1931_v31 = vld [vmem:[%s2530_s7 + $0x10] sm:$0xff]  }
  0xf2   : > { %1721 = vmatpush3.bf16.msra.mxu0 %v1928_v29  ;;  %v1933_v33 = vld [vmem:[%s2530_s7 + $0x20] sm:$0xff]  }
  0xf3   : > { %v555_v35 = vmax.f32 %v503_v32, 0.0  ;;  %1750 = vmatprep.subr.bf16.mxu0 %v2057_v1  ;;  %v1932_v32 = vld [vmem:[%s2530_s7 + $0x18] sm:$0xff]  }
  0xf5   : > { %v568_v36 = vpack.c.bf16 %v555_v35, %v554_v34  ;;  %v1934_v34 = vld [vmem:[%s2530_s7 + $0x28] sm:$0xff]   ;;  %v2322_v35 = vld [vmem:[%s2527_s4] ss:$0 sm:$0xff] }
  0xf6   : > { %v507_v37 = vpop.f32.mrb[4].mxu0 }
  0xf7   : > { %v508_v38 = vadd.f32 %v2261_v27, %v507_v37  ;;  %v1640_v39 = vpop.f32.mrb[5].mxu0  ;;  %1679 = vmatmul.mubr.bf16.vlgmr.msra.gmra.mrb[0].mxu1 %v568_v36 }
  0xf8   : > { %v510_v40 = vpop.f32.mrb[6].mxu0  ;;  %1682 = vmatprep.mubr.msk.bf16.mxu1 %vm2058_vm0, %v2057_v1  ;;  %1802 = vmatpush3.bf16.msra.mxu1 %v1929_v30 }
  0xf9   : > { %v511_v41 = vadd.f32 %v2261_v27, %v510_v40  ;;  %v1641_v42 = vpop.f32.mrb[7].mxu0  ;;  %v556_v43 = vmax.f32 %v508_v38, 0.0  ;;  %1795 = vmatprep.subr.bf16.mxu1 %v2057_v1 }
  0xfb   : > { %v557_v44 = vmax.f32 %v511_v41, 0.0 }
  0xfd   : > { %v569_v45 = vpack.c.bf16 %v557_v44, %v556_v43 }
  0xfe   : > { %v515_v46 = vpop.f32.mrb[8].mxu0 }
  0xff   : > { %v516_v47 = vadd.f32 %v2261_v27, %v515_v46  ;;  %v1644_v48 = vpop.f32.mrb[9].mxu0  ;;  %1683 = vmatmul.mubr.bf16.gmra.mrb[4].mxu1 %v569_v45 }
 0x100   : > { %v518_v49 = vpop.f32.mrb[10].mxu0  ;;  %1686 = vmatprep.mubr.msk.bf16.mxu1 %vm2058_vm0, %v2057_v1 }
 0x101   : > { %v519_v50 = vadd.f32 %v2261_v27, %v518_v49  ;;  %v1645_v51 = vpop.f32.mrb[11].mxu0  ;;  %v558_v52 = vmax.f32 %v516_v47, 0.0 }
 0x103   : > { %v559_v53 = vmax.f32 %v519_v50, 0.0 }
 0x105   : > { %v570_v54 = vpack.c.bf16 %v559_v53, %v558_v52 }
 0x106   : > { %v523_v55 = vpop.f32.mrb[12].mxu0 }
 0x107   : > { %v524_v56 = vadd.f32 %v2261_v27, %v523_v55  ;;  %v1648_v57 = vpop.f32.mrb[13].mxu0  ;;  %1687 = vmatmul.mubr.bf16.gmra.mrb[8].mxu1 %v570_v54 }
 0x108   : > { %v526_v58 = vpop.f32.mrb[14].mxu0  ;;  %1690 = vmatprep.mubr.msk.bf16.mxu1 %vm2058_vm0, %v2057_v1 }
 0x109   : > { %v527_v59 = vadd.f32 %v2261_v27, %v526_v58  ;;  %v1649_v60 = vpop.f32.mrb[15].mxu0  ;;  %v560_v61 = vmax.f32 %v524_v56, 0.0 }
 0x10b   : > { %v561_v62 = vmax.f32 %v527_v59, 0.0 }
 0x10d   : > { %v571_v63 = vpack.c.bf16 %v561_v62, %v560_v61 }
 0x10e   : > { %v531_v0 = vpop.f32.mrb[16].mxu0 }
 0x10f   : > { %v532_v2 = vadd.f32 %v2261_v27, %v531_v0  ;;  %v1652_v3 = vpop.f32.mrb[17].mxu0  ;;  %1691 = vmatmul.mubr.bf16.gmra.mrb[12].mxu1 %v571_v63 }
 0x110   : > { %v534_v4 = vpop.f32.mrb[18].mxu0  ;;  %1694 = vmatprep.mubr.msk.bf16.mxu1 %vm2058_vm0, %v2057_v1 }
 0x111   : > { %v535_v5 = vadd.f32 %v2261_v27, %v534_v4  ;;  %v1653_v6 = vpop.f32.mrb[19].mxu0  ;;  %v562_v7 = vmax.f32 %v532_v2, 0.0 }
 0x113   : > { %v563_v8 = vmax.f32 %v535_v5, 0.0 }
 0x115   : > { %v572_v9 = vpack.c.bf16 %v563_v8, %v562_v7 }
 0x116   : > { %v539_v10 = vpop.f32.mrb[20].mxu0 }
 0x117   : > { %v540_v11 = vadd.f32 %v2261_v27, %v539_v10  ;;  %v1656_v12 = vpop.f32.mrb[21].mxu0  ;;  %1695 = vmatmul.mubr.bf16.gmra.mrb[16].mxu1 %v572_v9 }
 0x118   : > { %v542_v13 = vpop.f32.mrb[22].mxu0  ;;  %1698 = vmatprep.mubr.msk.bf16.mxu1 %vm2058_vm0, %v2057_v1 }
 0x119   : > { %v543_v14 = vadd.f32 %v2261_v27, %v542_v13  ;;  %v1657_v15 = vpop.f32.mrb[23].mxu0  ;;  %v564_v16 = vmax.f32 %v540_v11, 0.0 }
 0x11b   : > { %v565_v17 = vmax.f32 %v543_v14, 0.0 }
 0x11d   : > { %v573_v18 = vpack.c.bf16 %v565_v17, %v564_v16 }
 0x11e   : > { %v547_v19 = vpop.f32.mrb[24].mxu0 }
 0x11f   : > { %v548_v20 = vadd.f32 %v2261_v27, %v547_v19  ;;  %v1660_v21 = vpop.f32.mrb[25].mxu0  ;;  %1699 = vmatmul.mubr.bf16.gmra.mrb[20].mxu1 %v573_v18 }
 0x120   : > { %v550_v22 = vpop.f32.mrb[26].mxu0  ;;  %1702 = vmatprep.mubr.msk.bf16.mxu1 %vm2058_vm0, %v2057_v1 }
 0x121   : > { %v551_v23 = vadd.f32 %v2261_v27, %v550_v22  ;;  %v1661_v24 = vpop.f32.mrb[27].mxu0  ;;  %v566_v25 = vmax.f32 %v548_v20, 0.0  ;;  %v1930_v27 = vld [vmem:[%s2530_s7 + $0x8] sm:$0xff]   ;;  %v1935_v22 = vld [vmem:[%s2530_s7 + $0x30] sm:$0xff]  }
 0x122   : > { %1803 = vmatpush3.bf16.msra.mxu1 %v1930_v27  ;;  %v2369_v24 = vld [vmem:[%s2529_s6] ss:$0 sm:$0xff] }
 0x123   : > { %v567_v26 = vmax.f32 %v551_v23, 0.0  ;;  %1796 = vmatprep.subr.bf16.mxu1 %v2057_v1  ;;  %v1936_v23 = vld [vmem:[%s2530_s7 + $0x38] sm:$0xff]  }
 0x125   : > { %v574_v28 = vpack.c.bf16 %v567_v26, %v566_v25 }
 0x126   : > { %1804 = vmatpush3.bf16.msra.mxu1 %v1931_v31 }
 0x127   : > { %1703 = vmatmul.mubr.bf16.gmra.mrb[24].mxu1 %v574_v28  ;;  %1797 = vmatprep.subr.bf16.mxu1 %v2057_v1 }
 0x128   : > { %1770 = vmatprep.mubr.msk.bf16.mxu1 %vm2058_vm0, %v2057_v1 }
 0x12a   : > { %1805 = vmatpush3.bf16.msra.mxu1 %v1932_v32 }
 0x12b   : > { %1798 = vmatprep.subr.bf16.mxu1 %v2057_v1 }
 0x12e   : > { %1806 = vmatpush3.bf16.msra.mxu1 %v1933_v33 }
 0x12f   : > { %1799 = vmatprep.subr.bf16.mxu1 %v2057_v1 }
 0x132   : > { %1807 = vmatpush3.bf16.msra.mxu1 %v1934_v34 }
 0x133   : > { %1800 = vmatprep.subr.bf16.mxu1 %v2057_v1 }
 0x136   : > { %1808 = vmatpush3.bf16.msra.mxu1 %v1935_v22 }
 0x137   : > { %1801 = vmatprep.subr.bf16.mxu1 %v2057_v1 }
 0x13a   : > { %1809 = vmatpush3.bf16.msra.mxu1 %v1936_v23 }
 0x1ca   : > { %v680_v36 = vpop.f32.mrb[0].mxu1 }
 0x1cb   : > { %v1680_v37 = vpop.f32.mrb[1].mxu1  ;;  %v681_v39 = vadd.f32 %v2322_v35, %v680_v36 }
 0x1cc   : > { %v683_v38 = vpop.f32.mrb[2].mxu1 }
 0x1cd   : > { %v684_v40 = vadd.f32 %v2322_v35, %v683_v38  ;;  %v1681_v41 = vpop.f32.mrb[3].mxu1 }
 0x1cf   : > { %v735_v42 = vpack.c.bf16 %v684_v40, %v681_v39 }
 0x1d1   : > { %1723 = vmatmul.mubr.bf16.vlgmr.msra.gmra.mrb[28].mxu0 %v735_v42 }
 0x1d2   : > { %v688_v43 = vpop.f32.mrb[4].mxu1  ;;  %1726 = vmatprep.mubr.msk.bf16.mxu0 %vm2058_vm0, %v2057_v1  ;;  %1751 = vmatpush3.bf16.msra.mxu0 %v1929_v30 }
 0x1d3   : > { %v1684_v44 = vpop.f32.mrb[5].mxu1  ;;  %1752 = vmatprep.subr.bf16.mxu0 %v2057_v1  ;;  %v689_v46 = vadd.f32 %v2322_v35, %v688_v43 }
 0x1d4   : > { %v691_v45 = vpop.f32.mrb[6].mxu1 }
 0x1d5   : > { %v692_v47 = vadd.f32 %v2322_v35, %v691_v45  ;;  %v1685_v48 = vpop.f32.mrb[7].mxu1 }
 0x1d6   : > { %1753 = vmatpush3.bf16.msra.mxu0 %v1930_v27 }
 0x1d7   : > { %v736_v49 = vpack.c.bf16 %v692_v47, %v689_v46  ;;  %1754 = vmatprep.subr.bf16.mxu0 %v2057_v1 }
 0x1d9   : > { %1727 = vmatmul.mubr.bf16.gmra.mrb[32].mxu0 %v736_v49 }
 0x1da   : > { %v696_v50 = vpop.f32.mrb[8].mxu1  ;;  %1730 = vmatprep.mubr.msk.bf16.mxu0 %vm2058_vm0, %v2057_v1  ;;  %1755 = vmatpush3.bf16.msra.mxu0 %v1931_v31 }
 0x1db   : > { %v1688_v51 = vpop.f32.mrb[9].mxu1  ;;  %1756 = vmatprep.subr.bf16.mxu0 %v2057_v1  ;;  %v697_v53 = vadd.f32 %v2322_v35, %v696_v50 }
 0x1dc   : > { %v699_v52 = vpop.f32.mrb[10].mxu1 }
 0x1dd   : > { %v700_v54 = vadd.f32 %v2322_v35, %v699_v52  ;;  %v1689_v55 = vpop.f32.mrb[11].mxu1 }
 0x1de   : > { %1757 = vmatpush3.bf16.msra.mxu0 %v1932_v32 }
 0x1df   : > { %v737_v56 = vpack.c.bf16 %v700_v54, %v697_v53  ;;  %1758 = vmatprep.subr.bf16.mxu0 %v2057_v1 }
 0x1e1   : > { %1731 = vmatmul.mubr.bf16.gmra.mrb[36].mxu0 %v737_v56 }
 0x1e2   : > { %v704_v57 = vpop.f32.mrb[12].mxu1  ;;  %1734 = vmatprep.mubr.msk.bf16.mxu0 %vm2058_vm0, %v2057_v1  ;;  %1759 = vmatpush3.bf16.msra.mxu0 %v1933_v33 }
 0x1e3   : > { %v1692_v58 = vpop.f32.mrb[13].mxu1  ;;  %1760 = vmatprep.subr.bf16.mxu0 %v2057_v1  ;;  %v705_v60 = vadd.f32 %v2322_v35, %v704_v57 }
 0x1e4   : > { %v707_v59 = vpop.f32.mrb[14].mxu1 }
 0x1e5   : > { %v708_v61 = vadd.f32 %v2322_v35, %v707_v59  ;;  %v1693_v62 = vpop.f32.mrb[15].mxu1 }
 0x1e6   : > { %1761 = vmatpush3.bf16.msra.mxu0 %v1934_v34 }
 0x1e7   : > { %v738_v63 = vpack.c.bf16 %v708_v61, %v705_v60  ;;  %1762 = vmatprep.subr.bf16.mxu0 %v2057_v1 }
 0x1e9   : > { %1735 = vmatmul.mubr.bf16.gmra.mrb[40].mxu0 %v738_v63 }
 0x1ea   : > { %v712_v0 = vpop.f32.mrb[16].mxu1  ;;  %1738 = vmatprep.mubr.msk.bf16.mxu0 %vm2058_vm0, %v2057_v1  ;;  %1763 = vmatpush3.bf16.msra.mxu0 %v1935_v22 }
 0x1eb   : > { %v1696_v2 = vpop.f32.mrb[17].mxu1  ;;  %v713_v4 = vadd.f32 %v2322_v35, %v712_v0  ;;  %1764 = vmatprep.subr.bf16.mxu0 %v2057_v1 }
 0x1ec   : > { %v715_v3 = vpop.f32.mrb[18].mxu1 }
 0x1ed   : > { %v716_v5 = vadd.f32 %v2322_v35, %v715_v3  ;;  %v1697_v6 = vpop.f32.mrb[19].mxu1 }
 0x1ee   : > { %1765 = vmatpush3.bf16.msra.mxu0 %v1936_v23 }
 0x1ef   : > { %v739_v7 = vpack.c.bf16 %v716_v5, %v713_v4 }
 0x1f1   : > { %1739 = vmatmul.mubr.bf16.gmra.mrb[44].mxu0 %v739_v7 }
 0x1f2   : > { %v720_v8 = vpop.f32.mrb[20].mxu1  ;;  %1742 = vmatprep.mubr.msk.bf16.mxu0 %vm2058_vm0, %v2057_v1 }
 0x1f3   : > { %v1700_v9 = vpop.f32.mrb[21].mxu1  ;;  %v721_v11 = vadd.f32 %v2322_v35, %v720_v8 }
 0x1f4   : > { %v723_v10 = vpop.f32.mrb[22].mxu1 }
 0x1f5   : > { %v724_v12 = vadd.f32 %v2322_v35, %v723_v10  ;;  %v1701_v13 = vpop.f32.mrb[23].mxu1 }
 0x1f7   : > { %v740_v14 = vpack.c.bf16 %v724_v12, %v721_v11 }
 0x1f9   : > { %1743 = vmatmul.mubr.bf16.gmra.mrb[48].mxu0 %v740_v14 }
 0x1fa   : > { %v728_v15 = vpop.f32.mrb[24].mxu1  ;;  %1746 = vmatprep.mubr.msk.bf16.mxu0 %vm2058_vm0, %v2057_v1 }
 0x1fb   : > { %v1704_v16 = vpop.f32.mrb[25].mxu1  ;;  %v729_v18 = vadd.f32 %v2322_v35, %v728_v15 }
 0x1fc   : > { %v731_v17 = vpop.f32.mrb[26].mxu1 }
 0x1fd   : > { %v732_v19 = vadd.f32 %v2322_v35, %v731_v17  ;;  %v1705_v20 = vpop.f32.mrb[27].mxu1 }
 0x1ff   : > { %v741_v21 = vpack.c.bf16 %v732_v19, %v729_v18 }
 0x201   : > { %1747 = vmatmul.mubr.bf16.gmra.mrb[52].mxu0 %v741_v21 }
 0x202   : > { %1766 = vmatprep.mubr.msk.bf16.mxu0 %vm2058_vm0, %v2057_v1 }
 0x2a4   : > { %v847_v25 = vpop.f32.mrb[28].mxu0 }
 0x2a5   : > { %v848_v26 = vadd.f32 %v2369_v24, %v847_v25  ;;  %v1724_v28 = vpop.f32.mrb[29].mxu0 }
 0x2a6   : > { %v850_v29 = vpop.f32.mrb[30].mxu0 }
 0x2a7   : > { %v851_v30 = vadd.f32 %v2369_v24, %v850_v29  ;;  %v1725_v27 = vpop.f32.mrb[31].mxu0  ;;  %v902_v31 = vmax.f32 %v848_v26, 0.0  ;;  %v2398_v26 = vld [vmem:[%s2531_s8] ss:$0 sm:$0xff] }
 0x2a9   : > { %v903_v32 = vmax.f32 %v851_v30, 0.0 }
 0x2ab   : > { %v916_v33 = vpack.c.bf16 %v903_v32, %v902_v31 }
 0x2ac   : > { %v855_v34 = vpop.f32.mrb[32].mxu0 }
 0x2ad   : > { %v856_v35 = vadd.f32 %v2369_v24, %v855_v34  ;;  %v1728_v36 = vpop.f32.mrb[33].mxu0  ;;  %1767 = vmatmul.mubr.bf16.vlgmr.msra.gmra.mrb[56].mxu0 %v916_v33 }
 0x2ae   : > { %v858_v37 = vpop.f32.mrb[34].mxu0 }
 0x2af   : > { %v859_v38 = vadd.f32 %v2369_v24, %v858_v37  ;;  %v1729_v39 = vpop.f32.mrb[35].mxu0  ;;  %v904_v40 = vmax.f32 %v856_v35, 0.0 }
 0x2b1   : > { %v905_v41 = vmax.f32 %v859_v38, 0.0 }
 0x2b3   : > { %v917_v42 = vpack.c.bf16 %v905_v41, %v904_v40 }
 0x2b4   : > { %v863_v43 = vpop.f32.mrb[36].mxu0 }
 0x2b5   : > { %v864_v44 = vadd.f32 %v2369_v24, %v863_v43  ;;  %v1732_v45 = vpop.f32.mrb[37].mxu0  ;;  %1771 = vmatmul.mubr.bf16.vlgmr.msra.gmra.mrb[28].mxu1 %v917_v42 }
 0x2b6   : > { %v866_v46 = vpop.f32.mrb[38].mxu0  ;;  %1774 = vmatprep.mubr.msk.bf16.mxu1 %vm2058_vm0, %v2057_v1 }
 0x2b7   : > { %v867_v47 = vadd.f32 %v2369_v24, %v866_v46  ;;  %v1733_v48 = vpop.f32.mrb[39].mxu0  ;;  %v906_v49 = vmax.f32 %v864_v44, 0.0 }
 0x2b9   : > { %v907_v50 = vmax.f32 %v867_v47, 0.0 }
 0x2bb   : > { %v918_v51 = vpack.c.bf16 %v907_v50, %v906_v49 }
 0x2bc   : > { %v871_v52 = vpop.f32.mrb[40].mxu0 }
 0x2bd   : > { %v872_v53 = vadd.f32 %v2369_v24, %v871_v52  ;;  %v1736_v54 = vpop.f32.mrb[41].mxu0  ;;  %1775 = vmatmul.mubr.bf16.gmra.mrb[32].mxu1 %v918_v51 }
 0x2be   : > { %v874_v55 = vpop.f32.mrb[42].mxu0  ;;  %1778 = vmatprep.mubr.msk.bf16.mxu1 %vm2058_vm0, %v2057_v1 }
 0x2bf   : > { %v875_v56 = vadd.f32 %v2369_v24, %v874_v55  ;;  %v1737_v57 = vpop.f32.mrb[43].mxu0  ;;  %v908_v58 = vmax.f32 %v872_v53, 0.0 }
 0x2c1   : > { %v909_v59 = vmax.f32 %v875_v56, 0.0 }
 0x2c3   : > { %v919_v60 = vpack.c.bf16 %v909_v59, %v908_v58 }
 0x2c4   : > { %v879_v61 = vpop.f32.mrb[44].mxu0 }
 0x2c5   : > { %v880_v62 = vadd.f32 %v2369_v24, %v879_v61  ;;  %v1740_v63 = vpop.f32.mrb[45].mxu0  ;;  %1779 = vmatmul.mubr.bf16.gmra.mrb[36].mxu1 %v919_v60 }
 0x2c6   : > { %v882_v0 = vpop.f32.mrb[46].mxu0  ;;  %1782 = vmatprep.mubr.msk.bf16.mxu1 %vm2058_vm0, %v2057_v1 }
 0x2c7   : > { %v883_v2 = vadd.f32 %v2369_v24, %v882_v0  ;;  %v1741_v3 = vpop.f32.mrb[47].mxu0  ;;  %v910_v4 = vmax.f32 %v880_v62, 0.0 }
 0x2c9   : > { %v911_v5 = vmax.f32 %v883_v2, 0.0 }
 0x2cb   : > { %v920_v6 = vpack.c.bf16 %v911_v5, %v910_v4 }
 0x2cc   : > { %v887_v7 = vpop.f32.mrb[48].mxu0 }
 0x2cd   : > { %v888_v8 = vadd.f32 %v2369_v24, %v887_v7  ;;  %v1744_v9 = vpop.f32.mrb[49].mxu0  ;;  %1783 = vmatmul.mubr.bf16.gmra.mrb[40].mxu1 %v920_v6 }
 0x2ce   : > { %v890_v10 = vpop.f32.mrb[50].mxu0  ;;  %1786 = vmatprep.mubr.msk.bf16.mxu1 %vm2058_vm0, %v2057_v1 }
 0x2cf   : > { %v891_v11 = vadd.f32 %v2369_v24, %v890_v10  ;;  %v1745_v12 = vpop.f32.mrb[51].mxu0  ;;  %v912_v13 = vmax.f32 %v888_v8, 0.0 }
 0x2d1   : > { %v913_v14 = vmax.f32 %v891_v11, 0.0 }
 0x2d3   : > { %v921_v15 = vpack.c.bf16 %v913_v14, %v912_v13 }
 0x2d4   : > { %v895_v16 = vpop.f32.mrb[52].mxu0 }
 0x2d5   : > { %v896_v17 = vadd.f32 %v2369_v24, %v895_v16  ;;  %v1748_v18 = vpop.f32.mrb[53].mxu0  ;;  %1787 = vmatmul.mubr.bf16.gmra.mrb[44].mxu1 %v921_v15 }
 0x2d6   : > { %v898_v19 = vpop.f32.mrb[54].mxu0  ;;  %1790 = vmatprep.mubr.msk.bf16.mxu1 %vm2058_vm0, %v2057_v1 }
 0x2d7   : > { %v899_v20 = vadd.f32 %v2369_v24, %v898_v19  ;;  %v1749_v21 = vpop.f32.mrb[55].mxu0  ;;  %v914_v22 = vmax.f32 %v896_v17, 0.0 }
 0x2d9   : > { %v915_v23 = vmax.f32 %v899_v20, 0.0 }
 0x2db   : > { %v922_v25 = vpack.c.bf16 %v915_v23, %v914_v22 }
 0x2dd   : > { %1791 = vmatmul.mubr.bf16.gmra.mrb[48].mxu1 %v922_v25 }
 0x380   : > { %v1028_v28 = vpop.f32.mrb[56].mxu0 }
 0x381   : > { %v1029_v29 = vadd.f32 %v2398_v26, %v1028_v28  ;;  %v1768_v30 = vpop.f32.mrb[57].mxu0 }
 0x382   : > { %v1031_v27 = vpop.f32.mrb[58].mxu0 }
 0x383   : > { %v1083_v31 = vmul.f32 0.5, %v1029_v29  ;;  %v1032_v1 = vadd.f32 %v2398_v26, %v1031_v27  ;;  %v1769_v24 = vpop.f32.mrb[59].mxu0 }
 0x385   : > { %1937 = vtanh.f32 %v1083_v31  ;;  %v1084_v32 = vmul.f32 0.5, %v1032_v1 }
 0x387   : > { %1939 = vtanh.f32 %v1084_v32 }
 0x388   : > { %v1036_v33 = vpop.f32.mrb[28].mxu1 }
 0x389   : > { %v1037_v34 = vadd.f32 %v2398_v26, %v1036_v33  ;;  %v1772_v35 = vpop.f32.mrb[29].mxu1 }
 0x38a   : > { %v1039_v36 = vpop.f32.mrb[30].mxu1 }
 0x38b   : > { %v1085_v37 = vmul.f32 0.5, %v1037_v34  ;;  %v1040_v38 = vadd.f32 %v2398_v26, %v1039_v36  ;;  %v1773_v39 = vpop.f32.mrb[31].mxu1 }
 0x38d   : > { %1941 = vtanh.f32 %v1085_v37  ;;  %v1086_v40 = vmul.f32 0.5, %v1040_v38 }
 0x38f   : > { %v1938_v41 = vpop.eup %1937  ;;  %1943 = vtanh.f32 %v1086_v40 }
 0x390   : > { %v1111_v42 = vmul.f32 0.5, %v1938_v41  ;;  %v1044_v43 = vpop.f32.mrb[32].mxu1 }
 0x391   : > { %v1940_v44 = vpop.eup %1939  ;;  %v1045_v45 = vadd.f32 %v2398_v26, %v1044_v43  ;;  %v1776_v46 = vpop.f32.mrb[33].mxu1 }
 0x392   : > { %v1125_v47 = vadd.f32 0.5, %v1111_v42  ;;  %v1112_v48 = vmul.f32 0.5, %v1940_v44  ;;  %v1047_v49 = vpop.f32.mrb[34].mxu1 }
 0x393   : > { %v1087_v50 = vmul.f32 0.5, %v1045_v45  ;;  %v1048_v51 = vadd.f32 %v2398_v26, %v1047_v49  ;;  %v1777_v52 = vpop.f32.mrb[35].mxu1 }
 0x394   : > { %v1555_v53 = vpack.c.bf16 %v1125_v47, %v1125_v47  ;;  %v1126_v54 = vadd.f32 0.5, %v1112_v48 }
 0x395   : > { %1945 = vtanh.f32 %v1087_v50  ;;  %v1088_v55 = vmul.f32 0.5, %v1048_v51 }
 0x396   : > { %1196 = vst.msk [vmem:[%s2407_s30] sm:$0xf] %vm1195_vm2, %v1555_v53  ;;  %v1556_v56 = vpack.c.bf16 %v1126_v54, %v1126_v54 }
 0x397   : > { %v1942_v57 = vpop.eup %1941  ;;  %1947 = vtanh.f32 %v1088_v55 }
 0x398   : > { %1197 = vst.msk [vmem:[%s2407_s30 + $0x4] sm:$0xf] %vm1195_vm2, %v1556_v56  ;;  %v1113_v58 = vmul.f32 0.5, %v1942_v57  ;;  %v1052_v59 = vpop.f32.mrb[36].mxu1 }
 0x399   : > { %v1944_v60 = vpop.eup %1943  ;;  %v1053_v61 = vadd.f32 %v2398_v26, %v1052_v59  ;;  %v1780_v62 = vpop.f32.mrb[37].mxu1 }
 0x39a   : > { %v1127_v63 = vadd.f32 0.5, %v1113_v58  ;;  %v1114_v0 = vmul.f32 0.5, %v1944_v60  ;;  %v1055_v2 = vpop.f32.mrb[38].mxu1 }
 0x39b   : > { %v1089_v3 = vmul.f32 0.5, %v1053_v61  ;;  %v1056_v4 = vadd.f32 %v2398_v26, %v1055_v2  ;;  %v1781_v5 = vpop.f32.mrb[39].mxu1 }
 0x39c   : > { %v1557_v6 = vpack.c.bf16 %v1127_v63, %v1127_v63  ;;  %v1128_v7 = vadd.f32 0.5, %v1114_v0 }
 0x39d   : > { %1949 = vtanh.f32 %v1089_v3  ;;  %v1090_v8 = vmul.f32 0.5, %v1056_v4 }
 0x39e   : > { %1198 = vst.msk [vmem:[%s2407_s30 + $0x8] sm:$0xf] %vm1195_vm2, %v1557_v6  ;;  %v1558_v9 = vpack.c.bf16 %v1128_v7, %v1128_v7 }
 0x39f   : > { %v1946_v10 = vpop.eup %1945  ;;  %1951 = vtanh.f32 %v1090_v8 }
 0x3a0   : > { %1199 = vst.msk [vmem:[%s2407_s30 + $0xc] sm:$0xf] %vm1195_vm2, %v1558_v9  ;;  %v1115_v11 = vmul.f32 0.5, %v1946_v10  ;;  %v1060_v12 = vpop.f32.mrb[40].mxu1 }
 0x3a1   : > { %v1948_v13 = vpop.eup %1947  ;;  %v1061_v14 = vadd.f32 %v2398_v26, %v1060_v12  ;;  %v1784_v15 = vpop.f32.mrb[41].mxu1 }
 0x3a2   : > { %v1129_v16 = vadd.f32 0.5, %v1115_v11  ;;  %v1116_v17 = vmul.f32 0.5, %v1948_v13  ;;  %v1063_v18 = vpop.f32.mrb[42].mxu1 }
 0x3a3   : > { %v1091_v19 = vmul.f32 0.5, %v1061_v14  ;;  %v1064_v20 = vadd.f32 %v2398_v26, %v1063_v18  ;;  %v1785_v21 = vpop.f32.mrb[43].mxu1 }
 0x3a4   : > { %v1559_v22 = vpack.c.bf16 %v1129_v16, %v1129_v16  ;;  %v1130_v23 = vadd.f32 0.5, %v1116_v17 }
 0x3a5   : > { %1953 = vtanh.f32 %v1091_v19  ;;  %v1092_v25 = vmul.f32 0.5, %v1064_v20 }
 0x3a6   : > { %1200 = vst.msk [vmem:[%s2407_s30 + $0x10] sm:$0xf] %vm1195_vm2, %v1559_v22  ;;  %v1560_v28 = vpack.c.bf16 %v1130_v23, %v1130_v23 }
 0x3a7   : > { %v1950_v29 = vpop.eup %1949  ;;  %1955 = vtanh.f32 %v1092_v25 }
 0x3a8   : > { %1201 = vst.msk [vmem:[%s2407_s30 + $0x14] sm:$0xf] %vm1195_vm2, %v1560_v28  ;;  %v1117_v30 = vmul.f32 0.5, %v1950_v29  ;;  %v1068_v27 = vpop.f32.mrb[44].mxu1 }
 0x3a9   : > { %v1952_v31 = vpop.eup %1951  ;;  %v1069_v1 = vadd.f32 %v2398_v26, %v1068_v27  ;;  %v1788_v24 = vpop.f32.mrb[45].mxu1 }
 0x3aa   : > { %v1131_v32 = vadd.f32 0.5, %v1117_v30  ;;  %v1118_v33 = vmul.f32 0.5, %v1952_v31  ;;  %v1071_v34 = vpop.f32.mrb[46].mxu1 }
 0x3ab   : > { %v1093_v35 = vmul.f32 0.5, %v1069_v1  ;;  %v1072_v36 = vadd.f32 %v2398_v26, %v1071_v34  ;;  %v1789_v37 = vpop.f32.mrb[47].mxu1 }
 0x3ac   : > { %v1561_v38 = vpack.c.bf16 %v1131_v32, %v1131_v32  ;;  %v1132_v39 = vadd.f32 0.5, %v1118_v33 }
 0x3ad   : > { %1957 = vtanh.f32 %v1093_v35  ;;  %v1094_v40 = vmul.f32 0.5, %v1072_v36 }
 0x3ae   : > { %1202 = vst.msk [vmem:[%s2407_s30 + $0x18] sm:$0xf] %vm1195_vm2, %v1561_v38  ;;  %v1562_v41 = vpack.c.bf16 %v1132_v39, %v1132_v39 }
 0x3af   : > { %v1954_v42 = vpop.eup %1953  ;;  %1959 = vtanh.f32 %v1094_v40 }
 0x3b0   : > { %1203 = vst.msk [vmem:[%s2407_s30 + $0x1c] sm:$0xf] %vm1195_vm2, %v1562_v41  ;;  %v1119_v43 = vmul.f32 0.5, %v1954_v42  ;;  %v1076_v44 = vpop.f32.mrb[48].mxu1 }
 0x3b1   : > { %v1956_v45 = vpop.eup %1955  ;;  %v1077_v46 = vadd.f32 %v2398_v26, %v1076_v44  ;;  %v1792_v47 = vpop.f32.mrb[49].mxu1 }
 0x3b2   : > { %v1133_v48 = vadd.f32 0.5, %v1119_v43  ;;  %v1120_v49 = vmul.f32 0.5, %v1956_v45  ;;  %v1079_v50 = vpop.f32.mrb[50].mxu1 }
 0x3b3   : > { %v1095_v51 = vmul.f32 0.5, %v1077_v46  ;;  %v1080_v52 = vadd.f32 %v2398_v26, %v1079_v50  ;;  %v1793_v53 = vpop.f32.mrb[51].mxu1 }
 0x3b4   : > { %v1563_v54 = vpack.c.bf16 %v1133_v48, %v1133_v48  ;;  %v1134_v55 = vadd.f32 0.5, %v1120_v49 }
 0x3b5   : > { %1961 = vtanh.f32 %v1095_v51  ;;  %v1096_v56 = vmul.f32 0.5, %v1080_v52 }
 0x3b6   : > { %1204 = vst.msk [vmem:[%s2407_s30 + $0x20] sm:$0xf] %vm1195_vm2, %v1563_v54  ;;  %v1564_v57 = vpack.c.bf16 %v1134_v55, %v1134_v55 }
 0x3b7   : > { %v1958_v58 = vpop.eup %1957  ;;  %1963 = vtanh.f32 %v1096_v56 }
 0x3b8   : > { %1205 = vst.msk [vmem:[%s2407_s30 + $0x24] sm:$0xf] %vm1195_vm2, %v1564_v57  ;;  %v1121_v59 = vmul.f32 0.5, %v1958_v58 }
 0x3b9   : > { %v1960_v60 = vpop.eup %1959 }
 0x3ba   : > { %v1135_v61 = vadd.f32 0.5, %v1121_v59  ;;  %v1122_v26 = vmul.f32 0.5, %v1960_v60 }
 0x3bc   : > { %v1565_v62 = vpack.c.bf16 %v1135_v61, %v1135_v61  ;;  %v1136_v63 = vadd.f32 0.5, %v1122_v26 }
 0x3be   : > { %1206 = vst.msk [vmem:[%s2407_s30 + $0x28] sm:$0xf] %vm1195_vm2, %v1565_v62  ;;  %v1566_v0 = vpack.c.bf16 %v1136_v63, %v1136_v63 }
 0x3bf   : > { %v1962_v2 = vpop.eup %1961 }
 0x3c0   : > { %1207 = vst.msk [vmem:[%s2407_s30 + $0x2c] sm:$0xf] %vm1195_vm2, %v1566_v0  ;;  %v1123_v3 = vmul.f32 0.5, %v1962_v2 }
 0x3c1   : > { %v1964_v4 = vpop.eup %1963 }
 0x3c2   : > { %v1137_v5 = vadd.f32 0.5, %v1123_v3  ;;  %v1124_v6 = vmul.f32 0.5, %v1964_v4  ;;  %1216 = sbr.rel (!%p2134_p4) target bundleno = 1040 (0x410), region = 60 }
 0x3c4   : > { %v1567_v7 = vpack.c.bf16 %v1137_v5, %v1137_v5  ;;  %v1138_v8 = vadd.f32 0.5, %v1124_v6 }
 0x3c6   : > { %1208 = vst.msk [vmem:[%s2407_s30 + $0x30] sm:$0xf] %vm1195_vm2, %v1567_v7  ;;  %v1568_v9 = vpack.c.bf16 %v1138_v8, %v1138_v8 }
 0x3c8   : > { %1209 = vst.msk [vmem:[%s2407_s30 + $0x34] sm:$0xf] %vm1195_vm2, %v1568_v9 }
 0x3c9   : > { %s2541_s19 = smov (!%p1219_p8, %s1218_s19), 14 }
 0x3ca   : > { %s1543_s25 = sshll.u32 %s2541_s19, 6 }
 0x3cb   : > { %p1546_p9 = scmp.eq.s32.totalorder %s1543_s25, 0 }
 0x3cc   : > { %1965 = sdivrem.u32 (!%p1546_p9), %s2541_s19, 14 }
 0x3cd   : > { %1227 = sbr.rel (%p1546_p9) target bundleno = 1040 (0x410), region = 64 }
 0x3d5   : > { %s2458_s17 = spop.drf %1965 }
 0x3d6   : > { %p1547_p10 = scmp.le.s32.totalorder %s2458_s17, 0 }
 0x3d7   : > { %s2534_s12 = smov (!%p1547_p10), %s2452_s24  ;;  %s2535_s22 = smov (!%p1547_p10), %s2407_s30 }
 0x3d8   : > { %1434 = sbr.rel (%p1547_p10) target bundleno = 1011 (0x3f3), region = 136  ;;  %s2467_s26 = smov (!%p1547_p10), 0  }
 0x3d9   : > { %s2469_s27 = smov (!%p1547_p10), 0  }
 0x3df LB: >> { %v1244_v10 = vld [vmem:[%s2031_s22] sm:$0xf]  ;;  %v1246_v11 = vld [vmem:[%s2031_s22 + $0x4] sm:$0xf]  ;;  %v1248_v12 = vld [vmem:[%s2031_s22 + $0x8] sm:$0xf]  ;;  %s2039_s27 = sphi %s2469_s27, %s1238_s27   ;;  %s2035_s26 = sphi %s2467_s26, %s2536_s26   ;;  %s2031_s22 = sphi %s2535_s22, %s1277_s22   ;;  %s2027_s12 = sphi %s2534_s12, %s1278_s12  }
 0x3e0   : >> { %1245 = vst [vmem:[%s2027_s12] sm:$0xf] %v1244_v10  ;;  %1247 = vst [vmem:[%s2027_s12 + $0x4] sm:$0xf] %v1246_v11  ;;  %v1250_v13 = vld [vmem:[%s2031_s22 + $0xc] sm:$0xf]  ;;  %s1272_s28 = sadd.s32 1, %s2035_s26 }
 0x3e1   : >> { %1249 = vst [vmem:[%s2027_s12 + $0x8] sm:$0xf] %v1248_v12  ;;  %v1252_v14 = vld [vmem:[%s2031_s22 + $0x10] sm:$0xf]  ;;  %v1254_v15 = vld [vmem:[%s2031_s22 + $0x14] sm:$0xf]  ;;  %p1273_p11 = scmp.ge.s32.totalorder %s1272_s28, %s2458_s17 }
 0x3e2   : >> { %1251 = vst [vmem:[%s2027_s12 + $0xc] sm:$0xf] %v1250_v13  ;;  %1253 = vst [vmem:[%s2027_s12 + $0x10] sm:$0xf] %v1252_v14  ;;  %v1256_v16 = vld [vmem:[%s2031_s22 + $0x18] sm:$0xf] }
 0x3e3   : >> { %1255 = vst [vmem:[%s2027_s12 + $0x14] sm:$0xf] %v1254_v15  ;;  %v1258_v17 = vld [vmem:[%s2031_s22 + $0x1c] sm:$0xf]  ;;  %v1260_v18 = vld [vmem:[%s2031_s22 + $0x20] sm:$0xf] }
 0x3e4   : >> { %1257 = vst [vmem:[%s2027_s12 + $0x18] sm:$0xf] %v1256_v16  ;;  %1259 = vst [vmem:[%s2027_s12 + $0x1c] sm:$0xf] %v1258_v17  ;;  %v1262_v19 = vld [vmem:[%s2031_s22 + $0x24] sm:$0xf] }
 0x3e5   : >> { %1261 = vst [vmem:[%s2027_s12 + $0x20] sm:$0xf] %v1260_v18  ;;  %v1264_v20 = vld [vmem:[%s2031_s22 + $0x28] sm:$0xf]  ;;  %v1266_v21 = vld [vmem:[%s2031_s22 + $0x2c] sm:$0xf] }
 0x3e6   : >> { %1263 = vst [vmem:[%s2027_s12 + $0x24] sm:$0xf] %v1262_v19  ;;  %1265 = vst [vmem:[%s2027_s12 + $0x28] sm:$0xf] %v1264_v20  ;;  %v1268_v22 = vld [vmem:[%s2031_s22 + $0x30] sm:$0xf] }
 0x3e7   : >> { %1267 = vst [vmem:[%s2027_s12 + $0x2c] sm:$0xf] %v1266_v21  ;;  %v1270_v23 = vld [vmem:[%s2031_s22 + $0x34] sm:$0xf]  ;;  %1269 = vst [vmem:[%s2027_s12 + $0x30] sm:$0xf] %v1268_v22 }
 0x3e8   : >> { %1271 = vst [vmem:[%s2027_s12 + $0x34] sm:$0xf] %v1270_v23  ;;  %s2543_s28 = smov (%p1273_p11, %s1272_s28), 0  ;;  %s1238_s27 = sadd.s32 1, %s2039_s27  }
 0x3e9   : >> { %s1275_s29 = smul.u32 56, %s2543_s28  ;;  %p1237_p12 = scmp.ge.s32.totalorder %s1238_s27, %s2458_s17 }
 0x3ea   : >> { %s2536_s26 = smov %s2543_s28 }
 0x3eb   : >> { %s1277_s22 = scalar_lea.vmem %s2407_s30, %s1275_s29 [#allocation2]   ;;  %s1278_s12 = scalar_lea.vmem %s2452_s24, %s1275_s29  }
 0x3ec   : > { %1240 = sbr.rel (!%p1237_p12) target bundleno = 991 (0x3df), region = 142 }
 0x3f3 PF: > { %1967 = sdivrem.u32 %s2541_s19, 14 }
 0x3f4   : > { %s1548_s11 = smul.u32 56, %s2458_s17 }
 0x3f6   : > { %s1283_s14 = scalar_lea.vmem %s2407_s30, %s1548_s11 [#allocation2]   ;;  %s1285_s15 = scalar_lea.vmem %s2452_s24, %s1548_s11  }
 0x3fc   : > { %s1968_s18 = spop.drf %1967 }
 0x3fd   : > { %p1550_p13 = scmp.le.s32.totalorder %s1968_s18, 0 }
 0x3fe   : > { %s2041_s20 = smov (!%p1550_p13), %s1285_s15   ;;  %s2045_s21 = smov (!%p1550_p13), %s1283_s14  }
 0x3ff   : > { %1448 = sbr.rel (%p1550_p13) target bundleno = 1040 (0x410), region = 147  ;;  %s2049_s23 = smov (!%p1550_p13), 0  }
 0x400   : > { %s2053_s25 = smov (!%p1550_p13), 0  }
 0x406 LB: >> { %v1295_v25 = vld [vmem:[%s2047_s21] sm:$0xf]  ;;  %s1297_s12 = sadd.s32 1, %s2051_s23  ;;  %s1289_s25 = sadd.s32 1, %s2055_s25   ;;  %s2055_s25 = sphi %s2053_s25, %s1289_s25   ;;  %s2051_s23 = sphi %s2049_s23, %s2050_s23   ;;  %s2047_s21 = sphi %s2045_s21, %s1302_s21   ;;  %s2043_s20 = sphi %s2041_s20, %s1303_s20  }
 0x407   : >> { %1296 = vst [vmem:[%s2043_s20] sm:$0xf] %v1295_v25  ;;  %p1298_p0 = scmp.ge.s32.totalorder %s1297_s12, %s1968_s18  ;;  %p1288_p1 = scmp.ge.s32.totalorder %s1289_s25, %s1968_s18 }
 0x409   : >> { %s2545_s12 = smov (%p1298_p0, %s1297_s12), 0  ;;  %1291 = sbr.rel (!%p1288_p1) target bundleno = 1030 (0x406), region = 153 }
 0x40a   : >> { %s1551_s30 = sshll.u32 %s2545_s12, 2  ;;  %s2050_s23 = smov %s2545_s12  }
 0x40b   : >> { %s1302_s21 = scalar_lea.vmem %s1283_s14, %s1551_s30 [#allocation2]   ;;  %s1303_s20 = scalar_lea.vmem %s1285_s15, %s1551_s30  }
 0x410 PF: > { %p16_p2 = scmp.ge.s32.totalorder %s2124_s13, 4   ;;  %s2537_s30 = smov %s2019_s10 }
 0x411   : > { %s2538_s10 = smov %s2132_s16  ;;  %s2539_s11 = smov %s2124_s13 }
 0x412   :  { %18 = sbr.rel (!%p16_p2) target bundleno = 2 (0x2), region = 164 }

</bundles_post_ra>
